<compile_context>
chip_gen: v7x
topology: tpu7x:2x2x1
jax: 0.10.0
libtpu: 0.0.40
codegen_flags: <defaults>
</compile_context>

<pallas_src>
import numpy as np
import jax
import jax.numpy as jnp
from jax.experimental import pallas as pl
from jax.experimental.pallas import tpu as pltpu

LANE = 128
SUBLANE = 8


def _round_up(x, m):
    return ((x + m - 1) // m) * m


def _choose_tile_r(R, W, bytes_per_elem, max_block_bytes, min_multi_tile_bytes=2 << 20):
    """Pick tile_r: a multiple of 8 dividing R, block <= max_block_bytes, and
    >= 2 tiles (preferring an even count) once the slab is large enough that
    megacore sharding / DMA pipelining pay off."""
    tile_cap = max(SUBLANE, (max_block_bytes // (W * bytes_per_elem)) // SUBLANE * SUBLANE)
    slab_bytes = R * W * bytes_per_elem
    want_tiles = 2 if slab_bytes > min_multi_tile_bytes else 1
    cands = [t for t in range(SUBLANE, R + 1, SUBLANE)
             if R % t == 0 and t <= tile_cap and (R // t) >= want_tiles]
    if not cands:
        return SUBLANE
    # Prefer an even tile count (or a single tile), then the largest tile
    # (fewer grid steps -> less fixed per-step overhead, ~0.35 us each).
    return max(cands, key=lambda t: ((R // t) == 1 or (R // t) % 2 == 0, t))


def _plan_layout(P, bytes_per_elem=4, max_block_bytes=4 << 20, w_cap=1024):
    """Plan a lane-dense (R, W) slab layout for P elements.

    Preferred: exact factorization P == R*W (W % 128 == 0, R % 8 == 0) -> the
    final reshape to `size` is free.  Fallback: padded slab + depad slice."""
    exact_w = None
    if P % LANE == 0:
        for W in range(LANE, min(w_cap, P) + 1, LANE):
            if P % W == 0 and (P // W) % SUBLANE == 0:
                exact_w = W                                   # keep the largest valid W
    if exact_w is not None:
        W = exact_w
        R = P // W
        tile_r = _choose_tile_r(R, W, bytes_per_elem, max_block_bytes)
        return W, R, tile_r, True
    # Padded fallback (oddly-shaped / tiny tensors; those normally take the
    # fused pure-JAX path anyway).
    W = min(w_cap, _round_up(P, LANE))
    rows_needed = -(-P // W)
    R0 = _round_up(rows_needed, SUBLANE)
    tile_r = _choose_tile_r(R0, W, bytes_per_elem, max_block_bytes)
    R = _round_up(R0, tile_r)
    return W, R, tile_r, False


def pwnet_pack(const, size, *, dtype=jnp.float32, max_block_bytes=4 << 20):
    """Pack the kernel bank ONCE (init time) into a lane-dense (K, R, W) slab.

    dtype=jnp.bfloat16 halves the HBM traffic of the (bandwidth-bound) forward
    if the downstream consumer accepts bf16 weights."""
    K = const.shape[0]
    P = int(np.prod(size))
    bytes_per_elem = np.dtype(dtype).itemsize
    W, R, tile_r, exact = _plan_layout(P, bytes_per_elem, max_block_bytes)
    flat = const.reshape(K, P).astype(dtype)
    if exact:
        slab = flat.reshape(K, R, W)
    else:
        slab = jnp.pad(flat, ((0, 0), (0, R * W - P))).reshape(K, R, W)
    return slab, (P, W, R, tile_r, exact)


def pwnet_kernel(idx_ref, dist_ref, cl_ref, cr_ref, out_ref):
    """idx_ref : scalar-prefetch SMEM (2,) int32 [left, right]  (used by index_maps)
       dist_ref: SMEM (1,) f32 precomputed lerp weight
       cl_ref / cr_ref: VMEM (tile_r, W) selected left/right row-tiles of the bank
       out_ref : VMEM (tile_r, W)
    """
    del idx_ref  # consumed by the BlockSpec index_maps
    dist = dist_ref[0]
    cl = cl_ref[...].astype(jnp.float32)
    cr = cr_ref[...].astype(jnp.float32)
    # cl*dist + (1-dist)*cr, written as cr + dist*(cl - cr): one fewer VPU multiply.
    out_ref[...] = (cr + dist * (cl - cr)).astype(out_ref.dtype)


def pwnet_forward_pallas(lam, slab, pivots, size, layout):
    """slab: (K, R, W) pre-packed bank; pivots: (K,) f32; lam: scalar."""
    P, W, R, tile_r, exact = layout
    K = slab.shape[0]
    dtype = slab.dtype

    lam = jnp.asarray(lam, jnp.float32)
    lam_ = lam * jnp.float32(0.99999)
    left = jnp.floor(lam_ * (K - 1)).astype(jnp.int32)
    # Clamp so the data-dependent DMA stays in bounds even if lam falls outside
    # [0, 1) (the PyTorch original would index OOB in that case anyway).
    left = jnp.clip(left, 0, K - 2)
    right = left + 1
    idx = jnp.stack([left, right]).astype(jnp.int32)                    # (2,)

    p_l = jnp.take(pivots, left)
    p_r = jnp.take(pivots, right)
    # NOTE: equal adjacent pivots -> div-by-zero, same as the PyTorch original.
    dist = ((p_r - lam_) / (p_r - p_l)).astype(jnp.float32).reshape(1)  # (1,)

    block_bytes = tile_r * W * dtype.itemsize
    # 3 pipelined streams (2 in + 1 out), double-buffered -> ~6x block bytes of
    # VMEM; give explicit headroom so large blocks don't hit the default scoped
    # limit, while staying well under v7x's 64 MiB physical VMEM.
    vmem_limit = int(min(48 << 20, max(32 << 20, 10 * block_bytes)))

    grid = (R // tile_r,)

    out = pl.pallas_call(
        pwnet_kernel,
        out_shape=jax.ShapeDtypeStruct((R, W), dtype),
        grid_spec=pltpu.PrefetchScalarGridSpec(
            num_scalar_prefetch=1,
            grid=grid,
            in_specs=[
                pl.BlockSpec(memory_space=pltpu.MemorySpace.SMEM),            # dist (1,)
                pl.BlockSpec((pl.Squeezed(), tile_r, W),
                             lambda i, idx: (idx[0], i, 0)),                  # const[left]
                pl.BlockSpec((pl.Squeezed(), tile_r, W),
                             lambda i, idx: (idx[1], i, 0)),                  # const[right]
            ],
            out_specs=pl.BlockSpec((tile_r, W), lambda i, idx: (i, 0)),
        ),
        compiler_params=pltpu.CompilerParams(
            dimension_semantics=("parallel",),     # megacore split on v7x; no-op v5e/v6e
            vmem_limit_bytes=vmem_limit,
        ),
    )(idx, dist, slab, slab)

    if exact:
        return out.reshape(size)                    # free metadata reshape (R*W == P)
    return out.reshape(R * W)[:P].reshape(size)     # fallback only: depad slice


def pwnet_reference(lam, const, pivots):
    """Pure-JAX PWNet forward (exact PyTorch semantics). Also the fast path for
    tiny parameter tensors (fuses with the consumer; no Pallas launch)."""
    K = const.shape[0]
    lam = jnp.asarray(lam, jnp.float32)
    lam_ = lam * jnp.float32(0.99999)
    left = jnp.floor(lam_ * (K - 1)).astype(jnp.int32)
    right = left + 1
    p_l = jnp.take(pivots, left)
    p_r = jnp.take(pivots, right)
    dist = (p_r - lam_) / (p_r - p_l)
    cl = jax.lax.dynamic_index_in_dim(const, left, 0, keepdims=False)
    cr = jax.lax.dynamic_index_in_dim(const, right, 0, keepdims=False)
    return cl * dist + (1.0 - dist) * cr


def pwnet_forward(lam, const, pivots, size, *, packed=None, min_pallas_elems=128 * 1024):
    """Dispatch: small banks (< ~0.5 MiB) -> fused pure JAX; otherwise Pallas.
    `packed` should be the (slab, layout) from pwnet_pack (done once at init)."""
    P = int(np.prod(size))
    if packed is None and P < min_pallas_elems:
        return pwnet_reference(lam, const, pivots).reshape(size)
    if packed is None:
        packed = pwnet_pack(const, size)   # prefer hoisting this to init time
    slab, layout = packed
    return pwnet_forward_pallas(lam, slab, pivots, size, layout)


if __name__ == "__main__":
    key = jax.random.PRNGKey(0)
    kernel_num = 4
    K = kernel_num
    size = (64, 32, 3, 3)        # conv-weight-shaped parameter tensor produced by PWNet

    # Deterministic synthetic init mimicking kaiming_uniform_(a=sqrt(5)):
    # bound = 1 / sqrt(fan_in), fan_in = prod(size[1:])
    fan_in = int(np.prod(size[1:]))
    bound = 1.0 / np.sqrt(fan_in)
    k1, k2 = jax.random.split(key)
    const = jax.random.uniform(k1, (K,) + size, jnp.float32, -bound, bound)
    pivots = jnp.linspace(0.0, 1.0, K).astype(jnp.float32)

    lam = jnp.float32(0.35)
    ref = pwnet_reference(lam, const, pivots)

    # 1) Exact-layout Pallas path: P = 18432 -> W=256, R=72, R*W == P (no depad copy).
    slab, layout = pwnet_pack(const, size)
    assert layout[4], "expected an exact (no-pad) slab layout for this size"
    out = jax.block_until_ready(pwnet_forward_pallas(lam, slab, pivots, size, layout))
    assert out.shape == size
    assert jnp.allclose(out, ref, atol=1e-6), "mismatch vs reference (exact layout)"

    # 2) Multi-tile (grid > 1) pipelined path: small blocks to force several row tiles.
    slab_t, layout_t = pwnet_pack(const, size, max_block_bytes=32 << 10)
    assert layout_t[2] // layout_t[3] > 1, "expected more than one row tile"
    out_t = jax.block_until_ready(pwnet_forward_pallas(lam, slab_t, pivots, size, layout_t))
    assert jnp.allclose(out_t, ref, atol=1e-6), "mismatch vs reference (tiled path)"

    # 3) Optional bf16 slab: half the HBM traffic; lerp still done in f32 in-kernel.
    slab_h, layout_h = pwnet_pack(const, size, dtype=jnp.bfloat16)
    out_h = jax.block_until_ready(pwnet_forward_pallas(lam, slab_h, pivots, size, layout_h))
    assert out_h.shape == size
    assert jnp.allclose(out_h.astype(jnp.float32), ref, atol=1e-2), "bf16 path mismatch"

    # 4) Tiny 1-D parameter (bias-like) takes the fused pure-JAX fallback path.
    small_size = (32,)
    const_small = jax.random.normal(k2, (K,) + small_size, jnp.float32)
    out_small = jax.block_until_ready(pwnet_forward(lam, const_small, pivots, small_size))
    ref_small = pwnet_reference(lam, const_small, pivots)
    assert out_small.shape == small_size
    assert jnp.allclose(out_small, ref_small, atol=1e-6)

    # 5) Dispatcher with a pre-packed bank routes through the Pallas kernel.
    out_d = jax.block_until_ready(
        pwnet_forward(lam, const, pivots, size, packed=(slab, layout)))
    assert jnp.allclose(out_d, ref, atol=1e-6)

    print("KERNEL_OK")
</pallas_src>

<mosaic_0001>
module attributes {stable_mosaic.version = 11 : i64} {
  func.func @pwnet_kernel(%arg0: i32, %arg1: memref<2xi32, #tpu.memory_space<smem>>, %arg2: memref<1xf32, #tpu.memory_space<smem>>, %arg3: memref<1x24x768xf32, #tpu.memory_space<vmem>>, %arg4: memref<1x24x768xf32, #tpu.memory_space<vmem>>, %arg5: memref<24x768xf32, #tpu.memory_space<vmem>>) attributes {dimension_semantics = [#tpu.dimension_semantics<parallel>], iteration_bounds = array<i64: 1>, scalar_prefetch = 1 : i64, scratch_operands = 0 : i64, tpu.core_type = #tpu.core_type<tc>, window_params = [{transform_indices = @transform_0, window_bounds = array<i64: 1>}, {transform_indices = @transform_1, window_bounds = array<i64: 1, 24, 768>}, {transform_indices = @transform_2, window_bounds = array<i64: 1, 24, 768>}, {transform_indices = @transform_3, window_bounds = array<i64: 24, 768>}]} {
    %c0 = arith.constant 0 : index
    %0 = memref.load %arg2[%c0] : memref<1xf32, #tpu.memory_space<smem>>
    %c0_0 = arith.constant 0 : index
    %c0_1 = arith.constant 0 : index
    %c0_2 = arith.constant 0 : index
    %1 = vector.load %arg3[%c0_0, %c0_1, %c0_2] : memref<1x24x768xf32, #tpu.memory_space<vmem>>, vector<1x24x768xf32>
    %2 = vector.shape_cast %1 : vector<1x24x768xf32> to vector<24x768xf32>
    %c0_3 = arith.constant 0 : index
    %c0_4 = arith.constant 0 : index
    %c0_5 = arith.constant 0 : index
    %3 = vector.load %arg4[%c0_3, %c0_4, %c0_5] : memref<1x24x768xf32, #tpu.memory_space<vmem>>, vector<1x24x768xf32>
    %4 = vector.shape_cast %3 : vector<1x24x768xf32> to vector<24x768xf32>
    %5 = arith.subf %2, %4 : vector<24x768xf32>
    %6 = vector.broadcast %0 : f32 to vector<24x768xf32>
    %7 = arith.mulf %6, %5 : vector<24x768xf32>
    %8 = arith.addf %4, %7 : vector<24x768xf32>
    %c0_6 = arith.constant 0 : index
    %c0_7 = arith.constant 0 : index
    %9 = vector.load %arg5[%c0_6, %c0_7] : memref<24x768xf32, #tpu.memory_space<vmem>>, vector<24x768xf32>
    tpu.vector_store %arg5[%c0_6, %c0_7], %8 {strides = array<i32>} : memref<24x768xf32, #tpu.memory_space<vmem>>, vector<24x768xf32>,
    return
  }
  func.func @transform_0(%arg0: i32, %arg1: memref<2xi32, #tpu.memory_space<smem>>) -> i32 {
    %c0_i32 = arith.constant 0 : i32
    %c0_i32_0 = arith.constant 0 : i32
    return %c0_i32 : i32
  }
  func.func @transform_1(%arg0: i32, %arg1: memref<2xi32, #tpu.memory_space<smem>>) -> (i32, i32, i32) {
    %c0 = arith.constant 0 : index
    %0 = memref.load %arg1[%c0] : memref<2xi32, #tpu.memory_space<smem>>
    %c0_i32 = arith.constant 0 : i32
    %c0_i32_0 = arith.constant 0 : i32
    return %0, %arg0, %c0_i32 : i32, i32, i32
  }
  func.func @transform_2(%arg0: i32, %arg1: memref<2xi32, #tpu.memory_space<smem>>) -> (i32, i32, i32) {
    %c1 = arith.constant 1 : index
    %0 = memref.load %arg1[%c1] : memref<2xi32, #tpu.memory_space<smem>>
    %c0_i32 = arith.constant 0 : i32
    %c0_i32_0 = arith.constant 0 : i32
    return %0, %arg0, %c0_i32 : i32, i32, i32
  }
  func.func @transform_3(%arg0: i32, %arg1: memref<2xi32, #tpu.memory_space<smem>>) -> (i32, i32) {
    %c0_i32 = arith.constant 0 : i32
    %c0_i32_0 = arith.constant 0 : i32
    return %arg0, %c0_i32 : i32, i32
  }
}

</mosaic_0001>

<bundles_post_ra>
// kernel: tpu_custom_call.1
= control target key start
LH: loop header
LB: loop body
LE: loop exit
PB: predicated region body
PF: predicated region fallthrough
CT: control target
= control target key end

     0   :  { %s393_s0 = inlined_call_operand.vmem [shape: s32[2], index: 0, kind: input, shape index: {}]   ;;  %s394_s1 = inlined_call_operand.<no memory space> [shape: f32[1], index: 1, kind: input, shape index: {}]   ;;  %s395_s2 = inlined_call_operand.hbm [shape: f32[4,24,768], index: 2, kind: input, shape index: {}]   ;;  %s396_s3 = inlined_call_operand.hbm [shape: f32[4,24,768], index: 3, kind: input, shape index: {}]   ;;  %s397_s4 = inlined_call_operand.hbm [shape: f32[24,768], index: 4, kind: output, shape index: {}]  }
   0x1   :  { %s9_s17 = sshll.u32 %s393_s0, 4  ;;  %s10_s17 = int_to_ptr.vmem [resolvable:$true] %s9_s17 }
   0x2   :  { %s204_s18 = scalar_lea.vmem %s10_s17, 16  ;;  %p209_p1 = scmp.lt.s32.totalorder %s10_s17, %s10_s17 }
   0x3   :  { %p205_p0 = scmp.ne.s32.totalorder %s10_s17, %s204_s18  ;;  %p210_p2 = scmp.lt.s32.totalorder %s204_s18, %s204_s18 }
   0x5   :  { %p211_p3 = por %p210_p2, %p209_p1 }
   0x7   :  { %p212_p4 = pnand %p211_p3, %p205_p0 }
   0x9   :  { %215 = shalt.err (!%p212_p4)  }
   0xa   :  { %s294_s19 = smov [#allocation3]  }
   0xb   :  { %12 = dma.vmem_to_smem %s10_s17, 16, %s294_s19, [#allocation2] }
   0xc   :  { %286 = dma.done.wait [#allocation2], 16 }
   0xd   :  { %287 = vsyncadd [#allocation2], 4294967280 }
   0xe   :  { %15 = sfence }
   0xf   :  { %16 = vsyncpa [#allocation6], 0 }
  0x10   :  { %17 = vsyncpa [#allocation9], 0 }
  0x11   :  { %18 = vsyncpa [#allocation7], 0  ;;  %s23_s20 = sld [smem:[#allocation3]]  ;;  %s295_s21 = smov [#allocation5]  }
  0x12   :  { %s30_s22 = sshll.u32 %s295_s21, 4  ;;  %s328_s0 = sld [smem:[#allocation3 + $0x1]]  ;;  %s31_s22 = int_to_ptr.vmem [resolvable:$true] %s30_s22 }
  0x13   :  { %s296_s24 = smov [#allocation8]   ;;  %s218_s6 = scalar_lea.hbm %s395_s2, 9216 }
  0x14   :  { %s46_s25 = sshll.u32 %s296_s24, 4  ;;  %s47_s25 = int_to_ptr.vmem [resolvable:$true] %s46_s25 }
  0x17   :  { %s196_s23 = smul.u32 2304, %s23_s20 }
  0x19   :  { %s29_s28 = scalar_lea.hbm %s395_s2, %s196_s23 }
  0x1a   :  { %s216_s29 = scalar_lea.hbm %s29_s28, 2304  ;;  %p219_p6 = scmp.lt.u32.totalorder %s29_s28, %s395_s2 }
  0x1b   :  { %p217_p5 = scmp.ne.s32.totalorder %s29_s28, %s216_s29  ;;  %p220_p7 = scmp.lt.u32.totalorder %s218_s6, %s216_s29 }
  0x1c   :  { %p222_p9 = scmp.lt.u32.totalorder %s216_s29, %s29_s28 }
  0x1d   :  { %p221_p8 = por %p220_p7, %p219_p6 }
  0x1f   :  { %p223_p10 = por %p222_p9, %p221_p8 }
  0x21   :  { %p224_p11 = pnand %p223_p10, %p217_p5 }
  0x23   :  { %227 = shalt.err (!%p224_p11)
}
  0x24   :  { %s228_s9 = scalar_lea.vmem %s31_s22, 2304  ;;  %p233_p13 = scmp.lt.s32.totalorder %s31_s22, %s31_s22 }
  0x25   :  { %p229_p12 = scmp.ne.s32.totalorder %s31_s22, %s228_s9  ;;  %p234_p0 = scmp.lt.s32.totalorder %s228_s9, %s228_s9 }
  0x27   :  { %p235_p1 = por %p234_p0, %p233_p13 }
  0x29   :  { %p236_p2 = pnand %p235_p1, %p229_p12 }
  0x2b   :  { %239 = shalt.err (!%p236_p2)
}
  0x2c   :  { %s297_s10 = smov 768   ;;  %s298_s11 = smov 48  }
  0x2d   :  { %36 = dma.hbm_to_vmem [thread:$0]  %s29_s28, 2304, %s31_s22, [#allocation6], %s297_s10, %s297_s10, %s298_s11  }
  0x2e   :  { %s197_s2 = smul.u32 2304, %s328_s0  ;;  %s242_s18 = scalar_lea.hbm %s396_s3, 9216 }
  0x30   :  { %s45_s14 = scalar_lea.hbm %s396_s3, %s197_s2 }
  0x31   :  { %s240_s15 = scalar_lea.hbm %s45_s14, 2304  ;;  %p243_p4 = scmp.lt.u32.totalorder %s45_s14, %s396_s3 }
  0x32   :  { %p241_p3 = scmp.ne.s32.totalorder %s45_s14, %s240_s15  ;;  %p244_p5 = scmp.lt.u32.totalorder %s242_s18, %s240_s15 }
  0x33   :  { %p246_p7 = scmp.lt.u32.totalorder %s240_s15, %s45_s14 }
  0x34   :  { %p245_p6 = por %p244_p5, %p243_p4 }
  0x36   :  { %p247_p8 = por %p246_p7, %p245_p6 }
  0x38   :  { %p248_p9 = pnand %p247_p8, %p241_p3 }
  0x3a   :  { %251 = shalt.err (!%p248_p9)
}
  0x3b   :  { %s252_s21 = scalar_lea.vmem %s47_s25, 2304  ;;  %p257_p11 = scmp.lt.s32.totalorder %s47_s25, %s47_s25 }
  0x3c   :  { %p253_p10 = scmp.ne.s32.totalorder %s47_s25, %s252_s21  ;;  %p258_p12 = scmp.lt.s32.totalorder %s252_s21, %s252_s21 }
  0x3e   :  { %p259_p13 = por %p258_p12, %p257_p11 }
  0x40   :  { %p260_p0 = pnand %p259_p13, %p253_p10 }
  0x42   :  { %263 = shalt.err (!%p260_p0)
}
  0x43   :  { %52 = dma.hbm_to_vmem [thread:$0]  %s45_s14, 2304, %s47_s25, [#allocation9], %s297_s10, %s297_s10, %s298_s11  }
  0x44   :  { %288 = dma.done.wait [#allocation6], 2304  }
  0x45   :  { %289 = vsyncadd [#allocation6], 4294964992 }
  0x46   :  { %290 = dma.done.wait [#allocation9], 2304  }
  0x47   :  { %291 = vsyncadd [#allocation9], 4294964992  ;;  %v62_v0 = vld [vmem:[#allocation5] sm:$0xff]  ;;  %v80_v1 = vld [vmem:[#allocation8] sm:$0xff]  ;;  %v358_v2 = vstv %s394_s1  ;;  %s299_s1 = smov [#allocation10]  }
  0x48   :  { %v63_v3 = vld [vmem:[#allocation5 + $0x8] sm:$0xff]  ;;  %v98_v4 = vsub.f32 %v62_v0, %v80_v1  ;;  %v81_v5 = vld [vmem:[#allocation8 + $0x8] sm:$0xff]  ;;  %v64_v6 = vld [vmem:[#allocation5 + $0x10] sm:$0xff]  ;;  %s176_s0 = sshll.u32 %s299_s1, 4  ;;  %s177_s0 = int_to_ptr.vmem [resolvable:$true] %s176_s0 }
  0x49   :  { %v82_v7 = vld [vmem:[#allocation8 + $0x10] sm:$0xff]  ;;  %v99_v8 = vsub.f32 %v63_v3, %v81_v5  ;;  %v65_v10 = vld [vmem:[#allocation5 + $0x18] sm:$0xff]  ;;  %v83_v11 = vld [vmem:[#allocation8 + $0x18] sm:$0xff]  ;;  %s264_s23 = scalar_lea.vmem %s177_s0, 2304  ;;  %p269_p2 = scmp.lt.s32.totalorder %s177_s0, %s177_s0 }
  0x4a   :  { %v100_v9 = vsub.f32 %v64_v6, %v82_v7  ;;  %v66_v12 = vld [vmem:[#allocation5 + $0x20] sm:$0xff]  ;;  %v117_v13 = vmul.f32 %v358_v2, %v98_v4  ;;  %v101_v14 = vsub.f32 %v65_v10, %v83_v11  ;;  %v84_v15 = vld [vmem:[#allocation8 + $0x20] sm:$0xff]  ;;  %v67_v16 = vld [vmem:[#allocation5 + $0x28] sm:$0xff]  ;;  %p265_p1 = scmp.ne.s32.totalorder %s177_s0, %s264_s23  ;;  %p270_p3 = scmp.lt.s32.totalorder %s264_s23, %s264_s23 }
  0x4b   :  { %v85_v17 = vld [vmem:[#allocation8 + $0x28] sm:$0xff]  ;;  %v118_v18 = vmul.f32 %v358_v2, %v99_v8  ;;  %v102_v20 = vsub.f32 %v66_v12, %v84_v15  ;;  %v68_v22 = vld [vmem:[#allocation5 + $0x30] sm:$0xff]  ;;  %v86_v23 = vld [vmem:[#allocation8 + $0x30] sm:$0xff] }
  0x4c   :  { %v119_v19 = vmul.f32 %v358_v2, %v100_v9  ;;  %v103_v21 = vsub.f32 %v67_v16, %v85_v17  ;;  %v69_v24 = vld [vmem:[#allocation5 + $0x38] sm:$0xff]  ;;  %v135_v25 = vadd.f32 %v117_v13, %v80_v1  ;;  %v120_v26 = vmul.f32 %v358_v2, %v101_v14  ;;  %v87_v28 = vld [vmem:[#allocation8 + $0x38] sm:$0xff]  ;;  %v70_v29 = vld [vmem:[#allocation5 + $0x40] sm:$0xff]  ;;  %p271_p4 = por %p270_p3, %p269_p2 }
  0x4d   :  { %v104_v27 = vsub.f32 %v68_v22, %v86_v23  ;;  %v88_v30 = vld [vmem:[#allocation8 + $0x40] sm:$0xff]  ;;  %v136_v31 = vadd.f32 %v118_v18, %v81_v5  ;;  %v121_v33 = vmul.f32 %v358_v2, %v102_v20  ;;  %v71_v35 = vld [vmem:[#allocation5 + $0x48] sm:$0xff]  ;;  %v89_v36 = vld [vmem:[#allocation8 + $0x48] sm:$0xff]  ;;  %v105_v40 = vsub.f32 %v69_v24, %v87_v28 }
  0x4e   :  { %v137_v32 = vadd.f32 %v119_v19, %v82_v7  ;;  %v122_v34 = vmul.f32 %v358_v2, %v103_v21  ;;  %v72_v37 = vld [vmem:[#allocation5 + $0x50] sm:$0xff]  ;;  %153 = vst [vmem:[#allocation10] sm:$0xff] %v135_v25  ;;  %v138_v38 = vadd.f32 %v120_v26, %v83_v11  ;;  %v106_v41 = vsub.f32 %v70_v29, %v88_v30  ;;  %v90_v42 = vld [vmem:[#allocation8 + $0x50] sm:$0xff]  ;;  %v73_v43 = vld [vmem:[#allocation5 + $0x58] sm:$0xff]  ;;  %p272_p5 = pnand %p271_p4, %p265_p1 }
  0x4f   :  { %v123_v39 = vmul.f32 %v358_v2, %v104_v27  ;;  %v91_v44 = vld [vmem:[#allocation8 + $0x58] sm:$0xff]  ;;  %154 = vst [vmem:[#allocation10 + $0x8] sm:$0xff] %v136_v31  ;;  %v139_v45 = vadd.f32 %v121_v33, %v84_v15  ;;  %v107_v47 = vsub.f32 %v71_v35, %v89_v36  ;;  %v108_v48 = vsub.f32 %v72_v37, %v90_v42  ;;  %v74_v49 = vld [vmem:[#allocation5 + $0x60] sm:$0xff]  ;;  %v92_v50 = vld [vmem:[#allocation8 + $0x60] sm:$0xff] }
  0x50   :  { %155 = vst [vmem:[#allocation10 + $0x10] sm:$0xff] %v137_v32  ;;  %v140_v46 = vadd.f32 %v122_v34, %v85_v17  ;;  %v75_v51 = vld [vmem:[#allocation5 + $0x68] sm:$0xff]  ;;  %156 = vst [vmem:[#allocation10 + $0x18] sm:$0xff] %v138_v38  ;;  %v124_v53 = vmul.f32 %v358_v2, %v105_v40  ;;  %v125_v54 = vmul.f32 %v358_v2, %v106_v41  ;;  %v93_v56 = vld [vmem:[#allocation8 + $0x68] sm:$0xff] }
  0x51   :  { %v141_v52 = vadd.f32 %v123_v39, %v86_v23  ;;  %v109_v55 = vsub.f32 %v73_v43, %v91_v44  ;;  %v76_v57 = vld [vmem:[#allocation5 + $0x70] sm:$0xff]  ;;  %v94_v58 = vld [vmem:[#allocation8 + $0x70] sm:$0xff]  ;;  %157 = vst [vmem:[#allocation10 + $0x20] sm:$0xff] %v139_v45  ;;  %v126_v59 = vmul.f32 %v358_v2, %v107_v47  ;;  %v127_v60 = vmul.f32 %v358_v2, %v108_v48  ;;  %v77_v63 = vld [vmem:[#allocation5 + $0x78] sm:$0xff] }
  0x52   :  { %158 = vst [vmem:[#allocation10 + $0x28] sm:$0xff] %v140_v46  ;;  %v110_v61 = vsub.f32 %v74_v49, %v92_v50  ;;  %v111_v62 = vsub.f32 %v75_v51, %v93_v56  ;;  %v95_v0 = vld [vmem:[#allocation8 + $0x78] sm:$0xff]  ;;  %v78_v1 = vld [vmem:[#allocation5 + $0x80] sm:$0xff]  ;;  %v142_v3 = vadd.f32 %v124_v53, %v87_v28  ;;  %v143_v4 = vadd.f32 %v125_v54, %v88_v30  ;;  %v96_v7 = vld [vmem:[#allocation8 + $0x80] sm:$0xff] }
  0x53   :  { %159 = vst [vmem:[#allocation10 + $0x30] sm:$0xff] %v141_v52  ;;  %v128_v5 = vmul.f32 %v358_v2, %v109_v55  ;;  %v112_v6 = vsub.f32 %v76_v57, %v94_v58  ;;  %v79_v8 = vld [vmem:[#allocation5 + $0x88] sm:$0xff]  ;;  %v97_v9 = vld [vmem:[#allocation8 + $0x88] sm:$0xff]  ;;  %v144_v10 = vadd.f32 %v126_v59, %v89_v36  ;;  %v145_v11 = vadd.f32 %v127_v60, %v90_v42 }
  0x54   :  { %v129_v12 = vmul.f32 %v358_v2, %v110_v61  ;;  %v130_v13 = vmul.f32 %v358_v2, %v111_v62  ;;  %160 = vst [vmem:[#allocation10 + $0x38] sm:$0xff] %v142_v3  ;;  %161 = vst [vmem:[#allocation10 + $0x40] sm:$0xff] %v143_v4  ;;  %v113_v16 = vsub.f32 %v77_v63, %v95_v0 }
  0x55   :  { %v146_v14 = vadd.f32 %v128_v5, %v91_v44  ;;  %v131_v15 = vmul.f32 %v358_v2, %v112_v6  ;;  %v114_v17 = vsub.f32 %v78_v1, %v96_v7  ;;  %162 = vst [vmem:[#allocation10 + $0x48] sm:$0xff] %v144_v10  ;;  %163 = vst [vmem:[#allocation10 + $0x50] sm:$0xff] %v145_v11 }
  0x56   :  { %v147_v18 = vadd.f32 %v129_v12, %v92_v50  ;;  %v148_v19 = vadd.f32 %v130_v13, %v93_v56  ;;  %v115_v20 = vsub.f32 %v79_v8, %v97_v9  ;;  %v132_v22 = vmul.f32 %v358_v2, %v113_v16 }
  0x57   :  { %164 = vst [vmem:[#allocation10 + $0x58] sm:$0xff] %v146_v14  ;;  %v149_v21 = vadd.f32 %v131_v15, %v94_v58  ;;  %v133_v23 = vmul.f32 %v358_v2, %v114_v17 }
  0x58   :  { %165 = vst [vmem:[#allocation10 + $0x60] sm:$0xff] %v147_v18  ;;  %166 = vst [vmem:[#allocation10 + $0x68] sm:$0xff] %v148_v19  ;;  %v134_v24 = vmul.f32 %v358_v2, %v115_v20  ;;  %v150_v25 = vadd.f32 %v132_v22, %v95_v0 }
  0x59   :  { %167 = vst [vmem:[#allocation10 + $0x70] sm:$0xff] %v149_v21  ;;  %v151_v26 = vadd.f32 %v133_v23, %v96_v7 }
  0x5a   :  { %v152_v27 = vadd.f32 %v134_v24, %v97_v9  ;;  %168 = vst [vmem:[#allocation10 + $0x78] sm:$0xff] %v150_v25 }
  0x5b   :  { %169 = vst [vmem:[#allocation10 + $0x80] sm:$0xff] %v151_v26 }
  0x5c   :  { %170 = vst [vmem:[#allocation10 + $0x88] sm:$0xff] %v152_v27 }
  0x5d   :  { %275 = shalt.err (!%p272_p5)
}
  0x5e   :  { %s276_s26 = scalar_lea.hbm %s397_s4, 2304 }
  0x5f   :  { %p277_p6 = scmp.ne.s32.totalorder %s397_s4, %s276_s26  ;;  %p280_p7 = scmp.lt.u32.totalorder %s276_s26, %s397_s4 }
  0x61   :  { %p282_p8 = pnand %p280_p7, %p277_p6 }
  0x63   :  { %285 = shalt.err (!%p282_p8)
}
  0x64   :  { %182 = dma.vmem_to_hbm [thread:$0]  %s177_s0, 2304, %s397_s4, [#allocation7], %s297_s10, %s297_s10, %s298_s11  }
  0x65   :  { %292 = dma.done.wait [#allocation7], 2304  }
  0x66   :  { %293 = vsyncadd [#allocation7], 4294964992 }
  0x67   :  { %186 = vsyncpa [#allocation6], 1 }
  0x68   :  { %187 = vsyncpa [#allocation9], 1 }
  0x69   :  { %188 = vsyncpa [#allocation7], 1 }

</bundles_post_ra>
